<compile_context>
chip_gen: v5e
topology: v5e:2x2
jax: 0.10.0
libtpu: 0.0.40
codegen_flags: <defaults>
</compile_context>

<pallas_src>
import jax
import jax.numpy as jnp
from jax.experimental import pallas as pl
from jax.experimental.pallas import tpu as pltpu


def _round_up(x, m):
    return ((x + m - 1) // m) * m


def _vmem_capacity_bytes():
    try:
        cap = int(pltpu.get_tpu_info().vmem_capacity_bytes)
        if cap > 0:
            return cap
    except Exception:
        pass
    return 64 * 1024 * 1024  # conservative default (v7x per-TC VMEM)


def general_attention_kernel(enc_ref, dec_ref, w_ref, mask_ref, ctx_ref, att_ref):
    # enc_ref : (Bt, Ep, Dinp)   dec_ref : (Bt, TD, Dout)
    # w_ref   : (Dout, Dinp)     mask_ref: (Bt, 1, Ep)   (f32)
    # ctx_ref : (Bt, TD, Dinp)   att_ref : (Bt, TD, Ep)  (f32)
    cdt = enc_ref.dtype                      # bf16 (default) or f32; set wrapper-side
    enc = enc_ref[...]                       # resident across the d axis (b-only map)
    dec = dec_ref[...]
    w = w_ref[...]

    # dq = dec @ W  (project the decoder; no transposes, fewer FLOPs when
    # dec_len < enc_len), then sim[b,t,e] = sum_i dq[b,t,i] * enc[b,e,i].
    dq = jnp.einsum("bto,oi->bti", dec, w,
                    preferred_element_type=jnp.float32)            # (Bt, TD, Dinp) f32
    sim = jnp.einsum("bti,bei->bte", dq.astype(cdt), enc,
                     preferred_element_type=jnp.float32)           # (Bt, TD, Ep) f32

    # Additive encoder mask (broadcast over decoder rows); padded encoder
    # positions carry mask==0 so they are neutralized here as well.
    sim = sim + (1.0 - mask_ref[...]) * -10000.0

    # Row softmax over encoder positions.
    m = jnp.max(sim, axis=-1, keepdims=True)
    p = jnp.exp(sim - m)
    denom = jnp.sum(p, axis=-1, keepdims=True)
    r = pl.reciprocal(denom, approx=True)                          # EUP slot
    r = r * (2.0 - denom * r)                                      # one Newton step (VPU)
    att = p * r                                                    # (Bt, TD, Ep) f32

    # context = att @ encoder_seq
    ctx = jnp.einsum("bte,bei->bti", att.astype(cdt), enc,
                     preferred_element_type=jnp.float32)           # (Bt, TD, Dinp) f32

    att_ref[...] = att.astype(att_ref.dtype)
    ctx_ref[...] = ctx.astype(ctx_ref.dtype)


def general_attention(encoder_seq, decoder_seq, weight, encoder_mask=None,
                      decoder_mask=None, *, use_bf16_matmul=True):
    """Non-bidirectional GeneralAttention forward.

    Returns (decoder_ctx, decoder_att), matching the PyTorch module with
    bidirectional=False.  `decoder_mask` is only used by the bidirectional branch.
    """
    del decoder_mask
    B, E, Din = encoder_seq.shape
    Bd, D, Dout = decoder_seq.shape
    assert Bd == B
    assert weight.shape == (Dout, Din)

    if encoder_mask is None:
        encoder_mask = jnp.ones((B, E), dtype=jnp.float32)

    comp_dtype = jnp.bfloat16 if use_bf16_matmul else jnp.float32
    in_elem = jnp.dtype(comp_dtype).itemsize

    # ---- Adaptive lane padding: pad E / Din to a multiple of 128 only when the
    # overhead is <= 2x; otherwise keep the true size (full-dim blocks). ----
    Ep = _round_up(E, 128) if _round_up(E, 128) <= 2 * E else E
    Dinp = _round_up(Din, 128) if _round_up(Din, 128) <= 2 * Din else Din

    # ---- VMEM-capacity-aware block sizing (double-buffered blocks + live f32
    # intermediates). ----
    cap = _vmem_capacity_bytes()
    budget = int(0.30 * cap)

    def working_set(bt, td):
        dbuf = 2 * (bt * Ep * Dinp * in_elem        # encoder block
                    + bt * td * Dout * in_elem      # decoder block
                    + Dout * Dinp * in_elem         # weight (shared)
                    + bt * Ep * 4                   # mask block
                    + bt * td * Dinp * 4            # ctx output block
                    + bt * td * Ep * 4)             # att output block
        inter = bt * td * (3 * Ep + 2 * Dinp) * 4   # sim/p/att + dq/ctx f32 temps
        return dbuf + inter

    # Decoder-row tile: whole D when small, else a 256-row tile; shrink if even a
    # single batch element overflows the budget (large E / Din).
    td = D if D <= 256 else 256
    while td > 8 and working_set(1, td) > budget:
        td = max(8, _round_up(td // 2, 8))
    Dp = D if td == D else _round_up(D, td)

    # Batch tile: largest divisor of B whose working set fits the budget, so no
    # fully-padded batch elements are ever computed.
    w_bytes = 2 * Dout * Dinp * in_elem
    per_bt = max(1, working_set(1, td) - w_bytes)
    bt_max = int(max(1, min(B, (budget - w_bytes) // per_bt)))
    Bt = 1
    for cand in range(bt_max, 0, -1):
        if B % cand == 0:
            Bt = cand
            break

    def _pad(x, shape):
        pads = [(0, t - s) for s, t in zip(x.shape, shape)]
        return jnp.pad(x, pads) if any(p for _, p in pads) else x

    # Cast to the compute dtype wrapper-side (halves the dominant encoder DMA and
    # removes the per-step in-kernel cast).  Mask stays f32.
    enc_p = _pad(encoder_seq.astype(comp_dtype), (B, Ep, Dinp))
    dec_p = _pad(decoder_seq.astype(comp_dtype), (B, Dp, Dout))
    w_p = _pad(weight.astype(comp_dtype), (Dout, Dinp))
    mask_p = _pad(encoder_mask.astype(jnp.float32).reshape(B, 1, E), (B, 1, Ep))

    grid = (B // Bt, Dp // td)

    grid_spec = pltpu.PrefetchScalarGridSpec(
        num_scalar_prefetch=0,
        grid=grid,
        in_specs=[
            pl.BlockSpec((Bt, Ep, Dinp), lambda b, d: (b, 0, 0)),   # encoder_seq
            pl.BlockSpec((Bt, td, Dout), lambda b, d: (b, d, 0)),   # decoder_seq
            pl.BlockSpec((Dout, Dinp), lambda b, d: (0, 0)),        # weight (shared)
            pl.BlockSpec((Bt, 1, Ep), lambda b, d: (b, 0, 0)),      # encoder_mask
        ],
        out_specs=[
            pl.BlockSpec((Bt, td, Dinp), lambda b, d: (b, d, 0)),   # decoder_ctx
            pl.BlockSpec((Bt, td, Ep), lambda b, d: (b, d, 0)),     # decoder_att
        ],
    )

    # ~40 MiB on v7x (64 MiB VMEM), ~80 MiB on v5e/v6e (128 MiB VMEM).
    vmem_limit = int(min(cap * 0.625, 100 * 1024 * 1024))

    ctx_p, att_p = pl.pallas_call(
        general_attention_kernel,
        out_shape=(
            jax.ShapeDtypeStruct((B, Dp, Dinp), jnp.float32),
            jax.ShapeDtypeStruct((B, Dp, Ep), jnp.float32),
        ),
        grid_spec=grid_spec,
        compiler_params=pltpu.CompilerParams(
            dimension_semantics=("parallel", "parallel"),
            vmem_limit_bytes=vmem_limit,
        ),
    )(enc_p, dec_p, w_p, mask_p)

    return ctx_p[:, :D, :Din], att_p[:, :D, :E]


def _reference(encoder_seq, decoder_seq, weight, encoder_mask):
    # Plain-JAX reproduction of the PyTorch forward (bidirectional=False).
    x = jnp.einsum("bed,od->beo", encoder_seq, weight)          # linear, no bias
    sim = jnp.einsum("bto,beo->bte", decoder_seq, x)            # (B, D, E)
    sim = sim + (1.0 - encoder_mask[:, None, :]) * -10000.0
    att = jax.nn.softmax(sim, axis=-1)
    ctx = jnp.einsum("bte,bed->btd", att, encoder_seq)
    return ctx, att


if __name__ == "__main__":
    B, E, D = 2, 16, 8          # batch, encoder_len, decoder_len
    Din, Dout = 32, 32          # input_size, output_size (== decoder hidden)

    key = jax.random.PRNGKey(0)
    k_enc, k_dec, k_w = jax.random.split(key, 3)

    encoder_seq = jax.random.normal(k_enc, (B, E, Din), dtype=jnp.float32)
    decoder_seq = jax.random.normal(k_dec, (B, D, Dout), dtype=jnp.float32)
    # Deterministic Linear weight init (Kaiming-uniform-like scale).
    bound = 1.0 / float(Din) ** 0.5
    weight = jax.random.uniform(k_w, (Dout, Din), dtype=jnp.float32,
                                minval=-bound, maxval=bound)
    # A non-trivial encoder mask (last 4 encoder positions masked for batch 1).
    encoder_mask = jnp.ones((B, E), dtype=jnp.float32).at[1, -4:].set(0.0)

    ctx, att = general_attention(encoder_seq, decoder_seq, weight, encoder_mask)
    jax.block_until_ready((ctx, att))

    ref_ctx, ref_att = _reference(encoder_seq, decoder_seq, weight, encoder_mask)

    # Default path uses bf16 MXU operands with f32 accumulation -> compare at a
    # bf16-level tolerance (use_bf16_matmul=False restores near-f32 agreement).
    assert jnp.allclose(att, ref_att, atol=5e-2, rtol=5e-2), \
        float(jnp.max(jnp.abs(att - ref_att)))
    assert jnp.allclose(ctx, ref_ctx, atol=5e-2, rtol=5e-2), \
        float(jnp.max(jnp.abs(ctx - ref_ctx)))
    # Newton-refined reciprocal: attention rows must sum to 1 tightly.
    assert jnp.allclose(jnp.sum(att, axis=-1), 1.0, atol=1e-3), \
        float(jnp.max(jnp.abs(jnp.sum(att, axis=-1) - 1.0)))

    print("KERNEL_OK")
</pallas_src>

<mosaic_0001>
module attributes {stable_mosaic.version = 11 : i64} {
  func.func @general_attention_kernel(%arg0: i32, %arg1: i32, %arg2: memref<2x16x32xbf16, #tpu.memory_space<vmem>>, %arg3: memref<2x8x32xbf16, #tpu.memory_space<vmem>>, %arg4: memref<32x32xbf16, #tpu.memory_space<vmem>>, %arg5: memref<2x1x16xf32, #tpu.memory_space<vmem>>, %arg6: memref<2x8x32xf32, #tpu.memory_space<vmem>>, %arg7: memref<2x8x16xf32, #tpu.memory_space<vmem>>) attributes {dimension_semantics = [#tpu.dimension_semantics<parallel>, #tpu.dimension_semantics<parallel>], iteration_bounds = array<i64: 1, 1>, scalar_prefetch = 0 : i64, scratch_operands = 0 : i64, tpu.core_type = #tpu.core_type<tc>, window_params = [{transform_indices = @transform_0, window_bounds = array<i64: 2, 16, 32>}, {transform_indices = @transform_1, window_bounds = array<i64: 2, 8, 32>}, {pipeline_mode = #tpu.pipeline_mode<synchronous>, transform_indices = @transform_2, window_bounds = array<i64: 32, 32>}, {transform_indices = @transform_3, window_bounds = array<i64: 2, 1, 16>}, {transform_indices = @transform_4, window_bounds = array<i64: 2, 8, 32>}, {transform_indices = @transform_5, window_bounds = array<i64: 2, 8, 16>}]} {
    %c0 = arith.constant 0 : index
    %c0_0 = arith.constant 0 : index
    %c0_1 = arith.constant 0 : index
    %0 = vector.load %arg2[%c0, %c0_0, %c0_1] : memref<2x16x32xbf16, #tpu.memory_space<vmem>>, vector<2x16x32xbf16>
    %c0_2 = arith.constant 0 : index
    %c0_3 = arith.constant 0 : index
    %c0_4 = arith.constant 0 : index
    %1 = vector.load %arg3[%c0_2, %c0_3, %c0_4] : memref<2x8x32xbf16, #tpu.memory_space<vmem>>, vector<2x8x32xbf16>
    %c0_5 = arith.constant 0 : index
    %c0_6 = arith.constant 0 : index
    %2 = vector.load %arg4[%c0_5, %c0_6] : memref<32x32xbf16, #tpu.memory_space<vmem>>, vector<32x32xbf16>
    "tpu.trace_start"() <{level = 10 : i32, message = "bto,oi->bti"}> : () -> ()
    %cst = arith.constant dense<0.000000e+00> : vector<2x8x32xf32>
    %3 = tpu.matmul %1, %2, %cst {dimension_numbers = #tpu.dot_dimension_numbers<[2], [0], [0, 1], [1], [0, 0, 0, 1, 1, 1], [], []>} : vector<2x8x32xbf16>, vector<32x32xbf16>, vector<2x8x32xf32> -> vector<2x8x32xf32>
    "tpu.trace_stop"() : () -> ()
    %4 = arith.truncf %3 : vector<2x8x32xf32> to vector<2x8x32xbf16>
    "tpu.trace_start"() <{level = 10 : i32, message = "bti,bei->bte"}> : () -> ()
    %cst_7 = arith.constant dense<0.000000e+00> : vector<2x8x16xf32>
    %5 = tpu.matmul %4, %0, %cst_7 {dimension_numbers = #tpu.dot_dimension_numbers<[2], [2], [1], [1], [0, 0, 0, 1, 1, 1], [0], [0]>} : vector<2x8x32xbf16>, vector<2x16x32xbf16>, vector<2x8x16xf32> -> vector<2x8x16xf32>
    "tpu.trace_stop"() : () -> ()
    %c0_8 = arith.constant 0 : index
    %c0_9 = arith.constant 0 : index
    %c0_10 = arith.constant 0 : index
    %6 = vector.load %arg5[%c0_8, %c0_9, %c0_10] : memref<2x1x16xf32, #tpu.memory_space<vmem>>, vector<2x1x16xf32>
    %cst_11 = arith.constant 1.000000e+00 : f32
    %7 = vector.broadcast %cst_11 : f32 to vector<2x1x16xf32>
    %8 = arith.subf %7, %6 : vector<2x1x16xf32>
    %cst_12 = arith.constant -1.000000e+04 : f32
    %9 = vector.broadcast %cst_12 : f32 to vector<2x1x16xf32>
    %10 = arith.mulf %8, %9 : vector<2x1x16xf32>
    %11 = vector.broadcast %10 : vector<2x1x16xf32> to vector<2x8x16xf32>
    %12 = arith.addf %5, %11 : vector<2x8x16xf32>
    %cst_13 = arith.constant dense<0xFF800000> : vector<2x8xf32>
    %13 = vector.multi_reduction <maximumf>, %12, %cst_13 [2] : vector<2x8x16xf32> to vector<2x8xf32>
    %14 = vector.shape_cast %13 : vector<2x8xf32> to vector<2x8x1xf32>
    %15 = vector.broadcast %14 : vector<2x8x1xf32> to vector<2x8x16xf32>
    %16 = arith.subf %12, %15 : vector<2x8x16xf32>
    %17 = math.exp %16 : vector<2x8x16xf32>
    %cst_14 = arith.constant dense<0.000000e+00> : vector<2x8xf32>
    %18 = vector.multi_reduction <add>, %17, %cst_14 [2] : vector<2x8x16xf32> to vector<2x8xf32>
    %19 = vector.shape_cast %18 : vector<2x8xf32> to vector<2x8x1xf32>
    %20 = tpu.reciprocal %19 {approx = true} : vector<2x8x1xf32> -> vector<2x8x1xf32>
    %21 = arith.mulf %19, %20 : vector<2x8x1xf32>
    %cst_15 = arith.constant 2.000000e+00 : f32
    %22 = vector.broadcast %cst_15 : f32 to vector<2x8x1xf32>
    %23 = arith.subf %22, %21 : vector<2x8x1xf32>
    %24 = arith.mulf %20, %23 : vector<2x8x1xf32>
    %25 = vector.broadcast %24 : vector<2x8x1xf32> to vector<2x8x16xf32>
    %26 = arith.mulf %17, %25 : vector<2x8x16xf32>
    %27 = arith.truncf %26 : vector<2x8x16xf32> to vector<2x8x16xbf16>
    "tpu.trace_start"() <{level = 10 : i32, message = "bte,bei->bti"}> : () -> ()
    %cst_16 = arith.constant dense<0.000000e+00> : vector<2x8x32xf32>
    %28 = tpu.matmul %27, %0, %cst_16 {dimension_numbers = #tpu.dot_dimension_numbers<[2], [1], [1], [2], [0, 0, 0, 1, 1, 2], [0], [0]>} : vector<2x8x16xbf16>, vector<2x16x32xbf16>, vector<2x8x32xf32> -> vector<2x8x32xf32>
    "tpu.trace_stop"() : () -> ()
    %c0_17 = arith.constant 0 : index
    %c0_18 = arith.constant 0 : index
    %c0_19 = arith.constant 0 : index
    %29 = vector.load %arg7[%c0_17, %c0_18, %c0_19] : memref<2x8x16xf32, #tpu.memory_space<vmem>>, vector<2x8x16xf32>
    tpu.vector_store %arg7[%c0_17, %c0_18, %c0_19], %26 {strides = array<i32>} : memref<2x8x16xf32, #tpu.memory_space<vmem>>, vector<2x8x16xf32>,
    %c0_20 = arith.constant 0 : index
    %c0_21 = arith.constant 0 : index
    %c0_22 = arith.constant 0 : index
    %30 = vector.load %arg6[%c0_20, %c0_21, %c0_22] : memref<2x8x32xf32, #tpu.memory_space<vmem>>, vector<2x8x32xf32>
    tpu.vector_store %arg6[%c0_20, %c0_21, %c0_22], %28 {strides = array<i32>} : memref<2x8x32xf32, #tpu.memory_space<vmem>>, vector<2x8x32xf32>,
    return
  }
  func.func @transform_0(%arg0: i32, %arg1: i32) -> (i32, i32, i32) {
    %c0_i32 = arith.constant 0 : i32
    %c0_i32_0 = arith.constant 0 : i32
    %c0_i32_1 = arith.constant 0 : i32
    return %arg0, %c0_i32, %c0_i32_0 : i32, i32, i32
  }
  func.func @transform_1(%arg0: i32, %arg1: i32) -> (i32, i32, i32) {
    %c0_i32 = arith.constant 0 : i32
    %c0_i32_0 = arith.constant 0 : i32
    return %arg0, %arg1, %c0_i32 : i32, i32, i32
  }
  func.func @transform_2(%arg0: i32, %arg1: i32) -> (i32, i32) {
    %c0_i32 = arith.constant 0 : i32
    %c0_i32_0 = arith.constant 0 : i32
    %c0_i32_1 = arith.constant 0 : i32
    return %c0_i32, %c0_i32_0 : i32, i32
  }
  func.func @transform_3(%arg0: i32, %arg1: i32) -> (i32, i32, i32) {
    %c0_i32 = arith.constant 0 : i32
    %c0_i32_0 = arith.constant 0 : i32
    %c0_i32_1 = arith.constant 0 : i32
    return %arg0, %c0_i32, %c0_i32_0 : i32, i32, i32
  }
  func.func @transform_4(%arg0: i32, %arg1: i32) -> (i32, i32, i32) {
    %c0_i32 = arith.constant 0 : i32
    %c0_i32_0 = arith.constant 0 : i32
    return %arg0, %arg1, %c0_i32 : i32, i32, i32
  }
  func.func @transform_5(%arg0: i32, %arg1: i32) -> (i32, i32, i32) {
    %c0_i32 = arith.constant 0 : i32
    %c0_i32_0 = arith.constant 0 : i32
    return %arg0, %arg1, %c0_i32 : i32, i32, i32
  }
}

</mosaic_0001>

<bundles_post_ra>
// kernel: tpu_custom_call.1
= control target key start
LH: loop header
LB: loop body
LE: loop exit
PB: predicated region body
PF: predicated region fallthrough
CT: control target
= control target key end

     0   :  { %11 = vsyncpa [#allocation3], 0  ;;  %s533_s0 = inlined_call_operand.hbm [shape: bf16[2,16,32], index: 0, kind: input, shape index: {}]   ;;  %s534_s1 = inlined_call_operand.hbm [shape: bf16[2,8,32], index: 1, kind: input, shape index: {}]   ;;  %s535_s2 = inlined_call_operand.hbm [shape: bf16[32,32], index: 2, kind: input, shape index: {}]   ;;  %s536_s3 = inlined_call_operand.vmem [shape: f32[2,1,16], index: 3, kind: input, shape index: {}]   ;;  %s537_s4 = inlined_call_operand.hbm [shape: f32[2,8,32], index: 4, kind: output, shape index: {0}]   ;;  %s538_s5 = inlined_call_operand.hbm [shape: f32[2,8,16], index: 5, kind: output, shape index: {1}]  }
   0x1   :  { %12 = vsyncpa [#allocation6], 0 }
   0x2   :  { %13 = vsyncpa [#allocation4], 0 }
   0x3   :  { %14 = vsyncpa [#allocation10], 0  ;;  %s32_s20 = sshll.u32 %s534_s1, 4  ;;  %s458_s21 = smov [#allocation5]   ;;  %s33_s20 = int_to_ptr.hbm [resolvable:$true] %s32_s20 }
   0x4   :  { %s34_s22 = sshll.u32 %s458_s21, 4  ;;  %s19_s25 = sshll.u32 %s533_s0, 4  ;;  %s35_s22 = int_to_ptr.vmem [resolvable:$true] %s34_s22  ;;  %s20_s25 = int_to_ptr.hbm [resolvable:$true] %s19_s25 }
   0x5   :  { %s459_s26 = smov 64   ;;  %s460_s27 = smov 4  }
   0x6   :  { %40 = dma.hbm_to_vmem [thread:$0]  %s33_s20, 128, %s35_s22, [#allocation6], %s459_s26, %s459_s26, %s460_s27  }
   0x7   :  { %s461_s28 = smov [#allocation2]   ;;  %s45_s7 = sshll.u32 %s535_s2, 4  ;;  %s46_s7 = int_to_ptr.hbm [resolvable:$true] %s45_s7 }
   0x8   :  { %s21_s29 = sshll.u32 %s461_s28, 4  ;;  %s462_s1 = smov [#allocation7]   ;;  %s22_s29 = int_to_ptr.vmem [resolvable:$true] %s21_s29 }
   0x9   :  { %27 = dma.hbm_to_vmem [thread:$0]  %s20_s25, 256, %s22_s29, [#allocation3], %s459_s26, %s459_s26, %s460_s27  }
   0xa   :  { %s47_s8 = sshll.u32 %s462_s1, 4  ;;  %s48_s8 = int_to_ptr.vmem [resolvable:$true] %s47_s8 }
   0xb   :  { %53 = dma.hbm_to_vmem [thread:$0]  %s46_s7, 256, %s48_s8, [#allocation6], %s459_s26, %s459_s26, %s460_s27  }
   0xc   :  { %450 = dma.done.wait [#allocation3], 256  }
   0xd   :  { %451 = vsyncadd [#allocation3], 4294967040 }
   0xe   :  { %452 = dma.done.wait [#allocation6], 384  }
   0xf   :  { %453 = vsyncadd [#allocation6], 4294966912  ;;  %v312_v0 = vld [vmem:[#allocation7 + $0x8] sm:$0xff]  ;;  %v311_v2 = vld [vmem:[#allocation7] sm:$0xff]  ;;  %vm96_vm0 = vcmask 261120   ;;  %vm176_vm1 = vcmask 130048  }
  0x10   :  { %v308_v1 = vld [vmem:[#allocation2] sm:$0xff]  ;;  %106 = vmatpush.bf16.msra.mxu0 %v312_v0  ;;  %v310_v4 = vld [vmem:[#allocation5] sm:$0xff]  ;;  %v309_v5 = vld [vmem:[#allocation2 + $0x8] sm:$0xff]  ;;  %s264_s14 = sshll.u32 %s538_s5, 4  ;;  %s464_s15 = smov 128   ;;  %s265_s14 = int_to_ptr.hbm [resolvable:$true] %s264_s14 }
  0x11   :  { %v137_v3 = vsel %vm96_vm0, %v308_v1, 0  ;;  %218 = vmatpush.bf16.msra.mxu3 %v308_v1  ;;  %v161_v6 = vsel %vm96_vm0, %v309_v5, 0  ;;  %v116_v11 = vld [vmem:[%s536_s3] sm:$0x1]  ;;  %v117_v16 = vld [vmem:[%s536_s3 + $0x1] sm:$0x1] }
  0x12   :  { %146 = vmatpush.bf16.xpose.msra.mxu1 %v137_v3  ;;  %170 = vmatpush.bf16.xpose.msra.mxu2 %v161_v6  ;;  %v118_v12 = vsub.f32 1.0, %v116_v11  ;;  %v119_v19 = vsub.f32 1.0, %v117_v16  ;;  %s463_s3 = smov [#allocation9]   ;;  %s465_s16 = smov 8  }
  0x13   :  { %s262_s11 = sshll.u32 %s463_s3, 4  ;;  %s466_s17 = smov [#allocation8]   ;;  %s263_s11 = int_to_ptr.vmem [resolvable:$true] %s262_s11 }
  0x14   :  { %107 = vmatpush.bf16.msra.mxu0 %v311_v2  ;;  %v120_v13 = vmul.f32 -10000.0, %v118_v12  ;;  %v121_v20 = vmul.f32 -10000.0, %v119_v19  ;;  %s249_s18 = sshll.u32 %s466_s17, 4  ;;  %s251_s21 = sshll.u32 %s537_s4, 4  ;;  %s250_s18 = int_to_ptr.vmem [resolvable:$true] %s249_s18  ;;  %s252_s21 = int_to_ptr.hbm [resolvable:$true] %s251_s21 }
  0x15   :  { %235 = vmatpush.bf16.msrb.mxu3 %v309_v5 }
  0x16   :  { %v124_v14 = vperm.slane %v120_v13, 0  ;;  %v125_v22 = vperm.slane %v121_v20, 0 }
  0x17   :  { %295 = vmatmul.msk.bf16.vlgmr.msra.gmra.mxu0 %vm96_vm0, %v310_v4 }
  0x94   :  { %v109_v7 = vpop.f32.mrf.mxu0 }
  0x95   :  { %v114_v8 = vpack.c.bf16 %v109_v7, %v109_v7 }
  0x97   :  { %300 = vmatmul.msk.bf16.vlgmr.msra.gmra.mxu1 %vm96_vm0, %v114_v8 }
  0x9c   :  { %v111_v9 = vpop.f32.mrf.mxu0 }
  0x9d   :  { %v115_v10 = vpack.c.bf16 %v111_v9, %v111_v9 }
  0x9f   :  { %305 = vmatmul.msk.bf16.vlgmr.msra.gmra.mxu2 %vm96_vm0, %v115_v10 }
 0x114   :  { %v148_v15 = vpop.f32.mrf.mxu1 }
 0x115   :  { %v149_v17 = vadd.f32 %v148_v15, %v124_v14 }
 0x117   :  { %v177_v18 = vsel %vm176_vm1, %v149_v17, -inf }
 0x118   :  { %178 = vmax.xlane.f32.xlu0 %v177_v18 }
 0x11c   :  { %v150_v21 = vpop.f32.mrf.mxu1 }
 0x122   :  { %v172_v23 = vpop.f32.mrf.mxu2 }
 0x123   :  { %v173_v24 = vadd.f32 %v172_v23, %v125_v22 }
 0x125   :  { %v180_v25 = vsel %vm176_vm1, %v173_v24, -inf }
 0x126   :  { %181 = vmax.xlane.f32.xlu0 %v180_v25 }
 0x12a   :  { %v174_v26 = vpop.f32.mrf.mxu2 }
 0x18b   :  { %v179_v27 = vpop.xlane.xlu0 %178 }
 0x18c   :  { %v183_v28 = vsub.f32 %v149_v17, %v179_v27 }
 0x18e   :  { %v185_v29 = vmul.f32 1.442695, %v183_v28 }
 0x190   :  { %322 = vpow2.f32 %v185_v29 }
 0x196   :  { %v323_v30 = vpop.eup %322 }
 0x197   :  { %v189_v31 = vsel %vm176_vm1, %v323_v30, 0.0 }
 0x198   :  { %190 = vadd.xlane.f32.xlu1 %v189_v31 }
 0x199   :  { %v182_v32 = vpop.xlane.xlu0 %181 }
 0x19a   :  { %v184_v33 = vsub.f32 %v173_v24, %v182_v32 }
 0x19c   :  { %v187_v34 = vmul.f32 1.442695, %v184_v33 }
 0x19e   :  { %324 = vpow2.f32 %v187_v34 }
 0x1a4   :  { %v325_v35 = vpop.eup %324 }
 0x1a5   :  { %v192_v36 = vsel %vm176_vm1, %v325_v35, 0.0 }
 0x1a6   :  { %193 = vadd.xlane.f32.xlu1 %v192_v36 }
 0x20b   :  { %v191_v37 = vpop.xlane.xlu1 %190 }
 0x20c   :  { %326 = vrcp.f32 %v191_v37 }
 0x212   :  { %v327_v38 = vpop.eup %326 }
 0x213   :  { %v197_v39 = vmul.f32 %v327_v38, %v191_v37 }
 0x215   :  { %v199_v40 = vsub.f32 2.0, %v197_v39 }
 0x217   :  { %v201_v41 = vmul.f32 %v327_v38, %v199_v40 }
 0x219   :  { %v194_v42 = vpop.xlane.xlu1 %193  ;;  %v203_v43 = vmul.f32 %v323_v30, %v201_v41 }
 0x21a   :  { %328 = vrcp.f32 %v194_v42 }
 0x21b   :  { %v205_v44 = vpack.c.bf16 %v203_v43, %v203_v43  ;;  %241 = vst.msk [vmem:[#allocation9] sm:$0xff] %vm176_vm1, %v203_v43 }
 0x21d   :  { %306 = vmatmul.msk.bf16.vlgmr.msra.gmra.mxu3 %vm176_vm1, %v205_v44 }
 0x220   :  { %v329_v45 = vpop.eup %328 }
 0x221   :  { %v198_v46 = vmul.f32 %v329_v45, %v194_v42 }
 0x223   :  { %v200_v47 = vsub.f32 2.0, %v198_v46 }
 0x225   :  { %v202_v48 = vmul.f32 %v329_v45, %v200_v47 }
 0x227   :  { %v204_v49 = vmul.f32 %v325_v35, %v202_v48 }
 0x229   :  { %242 = vst.msk [vmem:[#allocation9 + $0x8] sm:$0xff] %vm176_vm1, %v204_v49  ;;  %v206_v50 = vpack.c.bf16 %v204_v49, %v204_v49 }
 0x22a   :  { %270 = dma.vmem_to_hbm [thread:$0]  %s263_s11, 256, %s265_s14, [#allocation10], %s464_s15, %s464_s15, %s465_s16  }
 0x22d   :  { %307 = vmatmul.msk.bf16.vlgmr.msrb.gmra.mxu3 %vm176_vm1, %v206_v50 }
 0x2a0   :  { %v220_v51 = vpop.f32.mrf.mxu3 }
 0x2a1   :  { %243 = vst.msk [vmem:[#allocation8] sm:$0xff] %vm96_vm0, %v220_v51 }
 0x2a8   :  { %v222_v52 = vpop.f32.mrf.mxu3 }
 0x2b0   :  { %v237_v53 = vpop.f32.mrf.mxu3 }
 0x2b1   :  { %244 = vst.msk [vmem:[#allocation8 + $0x8] sm:$0xff] %vm96_vm0, %v237_v53 }
 0x2b2   :  { %257 = dma.vmem_to_hbm [thread:$0]  %s250_s18, 256, %s252_s21, [#allocation4], %s464_s15, %s464_s15, %s465_s16  }
 0x2b8   :  { %v239_v54 = vpop.f32.mrf.mxu3 }
 0x2b9   :  { %454 = dma.done.wait [#allocation4], 256  }
 0x2ba   :  { %455 = vsyncadd [#allocation4], 4294967040 }
 0x2bb   :  { %456 = dma.done.wait [#allocation10], 256  }
 0x2bc   :  { %457 = vsyncadd [#allocation10], 4294967040 }
 0x2bd   :  { %279 = vsyncpa [#allocation3], 1 }
 0x2be   :  { %280 = vsyncpa [#allocation6], 1 }
 0x2bf   :  { %281 = vsyncpa [#allocation4], 1 }
 0x2c0   :  { %282 = vsyncpa [#allocation10], 1 }

</bundles_post_ra>
